<compile_context>
chip_gen: v5e
topology: v5e:2x2
jax: 0.10.0
libtpu: 0.0.40
codegen_flags: <defaults>
</compile_context>

<pallas_src>
import functools

import jax
import jax.numpy as jnp
from jax import lax
from jax.experimental import pallas as pl
from jax.experimental.pallas import tpu as pltpu

HIDDEN = 100
HIDDEN_PAD = 128                 # 100 padded to a full lane width; col 100 = bias lane
_X_STREAM_VMEM_BUDGET = 24 << 20  # double-buffered x blocks; fits v7x's 64 MiB VMEM


def mine_kernel(x_ref, w1_ref, b1_ref, w2_ref, o_ref):
    x = x_ref[...]
    w1 = w1_ref[...]
    if x.dtype != w1.dtype:          # static: trace-time dtype check only
        x = x.astype(w1.dtype)
    # fc1 + ReLU: (TB, D) @ (D, 128) -> (TB, 128), f32 accumulation on the MXU.
    h = jnp.dot(x, w1, preferred_element_type=jnp.float32)
    h = jnp.maximum(h + b1_ref[...], 0.0)
    # fc2 (+ folded bias): contract h's lane dim against the (1, 128) w2 row,
    # yielding a lane-dense (1, TB) result.
    y = lax.dot_general(
        w2_ref[...], h,
        dimension_numbers=(((1,), (1,)), ((), ())),
        preferred_element_type=jnp.float32)
    o_ref[...] = jnp.tanh(y).astype(o_ref.dtype)


def prepare_params(w1, b1, w2, b2, dtype=jnp.float32):
    """Pad hidden 100 -> 128, fold fc2's bias into the padding, cast w1 to `dtype`."""
    d, h = w1.shape
    w1p = jnp.zeros((d, HIDDEN_PAD), jnp.float32).at[:, :h].set(w1)
    b1p = jnp.zeros((1, HIDDEN_PAD), jnp.float32).at[0, :h].set(b1)
    b1p = b1p.at[0, h].set(1.0)                 # bias lane: relu(0 + 1.0) == 1.0
    w2p = jnp.zeros((1, HIDDEN_PAD), jnp.float32).at[0, :h].set(w2[:, 0])
    w2p = w2p.at[0, h].set(b2[0])               # folded fc2 bias
    return w1p.astype(dtype), b1p, w2p          # b1/w2 row stay f32 (post-MXU math)


def _round_up(x, m):
    return (x + m - 1) // m * m


def _choose_tile(batch, d, itemsize, tb_cap):
    """Batch-tile rows from the x dtype / input_dim against a VMEM budget."""
    if batch <= 128:
        return batch                                   # single full-array block
    row_bytes = _round_up(d, 128) * itemsize           # lane-padded VMEM footprint
    tb = _X_STREAM_VMEM_BUDGET // (2 * row_bytes)      # double-buffered x stream
    tb = min(tb, tb_cap, _round_up(-(-batch // 2), 128))  # >= 2 grid steps (v7x 2 TCs)
    return max(128, (tb // 128) * 128)


@functools.partial(jax.jit, static_argnames=("use_pallas", "tb_cap"))
def mine_forward(x, w1p, b1p, w2p, *, use_pallas=None, tb_cap=8192):
    B, D = x.shape
    if use_pallas is None:
        use_pallas = B >= 1024      # tiny batches: fused XLA beats per-step overhead
    if not use_pallas:
        h = jnp.maximum(
            jnp.dot(x.astype(w1p.dtype), w1p, preferred_element_type=jnp.float32)
            + b1p, 0.0)
        y = jnp.dot(h, w2p[0], preferred_element_type=jnp.float32)
        return jnp.tanh(y).reshape(B, 1).astype(x.dtype)

    itemsize = jnp.dtype(x.dtype).itemsize
    TB = _choose_tile(B, D, itemsize, tb_cap)
    G = pl.cdiv(B, TB)

    # Explicit scoped-VMEM limit: double-buffered x + out blocks, resident weights,
    # ~30% headroom, never below the 32 MiB default.
    x_block = TB * _round_up(D, 128) * itemsize
    out_block = 8 * TB * 4
    w_bytes = _round_up(D, 8) * 128 * jnp.dtype(w1p.dtype).itemsize + 2 * 8 * 128 * 4
    vmem_limit = int(1.3 * (2 * (x_block + out_block) + w_bytes)) + (2 << 20)
    vmem_limit = min(max(vmem_limit, 32 << 20), 100 << 20)

    out = pl.pallas_call(
        mine_kernel,
        out_shape=jax.ShapeDtypeStruct((1, B), jnp.float32),
        grid=(G,),
        in_specs=[
            pl.BlockSpec((TB, D), lambda i: (i, 0)),           # x tile (pipelined)
            pl.BlockSpec((D, HIDDEN_PAD), lambda i: (0, 0)),   # w1 (VMEM-resident)
            pl.BlockSpec((1, HIDDEN_PAD), lambda i: (0, 0)),   # b1 (+ bias lane)
            pl.BlockSpec((1, HIDDEN_PAD), lambda i: (0, 0)),   # w2 row (+ folded b2)
        ],
        out_specs=pl.BlockSpec((1, TB), lambda i: (0, i)),     # lane-dense output
        compiler_params=pltpu.CompilerParams(
            dimension_semantics=("parallel",),
            vmem_limit_bytes=vmem_limit),
    )(x, w1p, b1p, w2p)

    return out.reshape(B, 1).astype(x.dtype)


def init_params(key, input_dim, hidden=HIDDEN, out=1):
    # Deterministic init mimicking nn.Linear's default U(-1/sqrt(fan_in), 1/sqrt(fan_in)).
    k1, k2, k3, k4 = jax.random.split(key, 4)
    bound1 = 1.0 / jnp.sqrt(jnp.float32(input_dim))
    bound2 = 1.0 / jnp.sqrt(jnp.float32(hidden))
    w1 = jax.random.uniform(k1, (input_dim, hidden), jnp.float32, -bound1, bound1)
    b1 = jax.random.uniform(k2, (hidden,), jnp.float32, -bound1, bound1)
    w2 = jax.random.uniform(k3, (hidden, out), jnp.float32, -bound2, bound2)
    b2 = jax.random.uniform(k4, (out,), jnp.float32, -bound2, bound2)
    return w1, b1, w2, b2


if __name__ == "__main__":
    key = jax.random.PRNGKey(0)
    kx, kp, kx2 = jax.random.split(key, 3)

    batch, input_dim = 8, 32
    x = jax.random.normal(kx, (batch, input_dim), dtype=jnp.float32)
    w1, b1, w2, b2 = init_params(kp, input_dim)

    # f32 params, Pallas path forced even at tiny batch so the kernel is exercised.
    w1p, b1p, w2p = prepare_params(w1, b1, w2, b2, dtype=jnp.float32)
    out = jax.block_until_ready(mine_forward(x, w1p, b1p, w2p, use_pallas=True))
    ref = jnp.tanh(jnp.maximum(x @ w1 + b1, 0.0) @ w2 + b2)
    assert out.shape == (batch, 1)
    assert jnp.allclose(out, ref, atol=1e-5, rtol=1e-5)

    # Small-batch default path (fused XLA fallback) should match too.
    out_fb = jax.block_until_ready(mine_forward(x, w1p, b1p, w2p))
    assert jnp.allclose(out_fb, ref, atol=1e-5, rtol=1e-5)

    # Multi-tile, tile-unaligned batch: exercises ragged last block (no wrapper pad).
    B2 = 1000
    x2 = jax.random.normal(kx2, (B2, input_dim), dtype=jnp.float32)
    out2 = jax.block_until_ready(mine_forward(x2, w1p, b1p, w2p, use_pallas=True))
    ref2 = jnp.tanh(jnp.maximum(x2 @ w1 + b1, 0.0) @ w2 + b2)
    assert out2.shape == (B2, 1)
    assert jnp.allclose(out2, ref2, atol=1e-5, rtol=1e-5)

    # bf16 x / w1 path (halves the dominant HBM stream); looser tolerance.
    w1p16, b1p16, w2p16 = prepare_params(w1, b1, w2, b2, dtype=jnp.bfloat16)
    out3 = jax.block_until_ready(
        mine_forward(x2.astype(jnp.bfloat16), w1p16, b1p16, w2p16, use_pallas=True))
    assert jnp.allclose(out3.astype(jnp.float32), ref2, atol=5e-2, rtol=5e-2)

    print("KERNEL_OK")
</pallas_src>

<mosaic_0001>
module attributes {stable_mosaic.version = 11 : i64} {
  func.func @mine_kernel(%arg0: i32, %arg1: memref<8x32xf32, #tpu.memory_space<vmem>>, %arg2: memref<32x128xf32, #tpu.memory_space<vmem>>, %arg3: memref<1x128xf32, #tpu.memory_space<vmem>>, %arg4: memref<1x128xf32, #tpu.memory_space<vmem>>, %arg5: memref<1x8xf32, #tpu.memory_space<vmem>>) attributes {dimension_semantics = [#tpu.dimension_semantics<parallel>], iteration_bounds = array<i64: 1>, scalar_prefetch = 0 : i64, scratch_operands = 0 : i64, tpu.core_type = #tpu.core_type<tc>, window_params = [{transform_indices = @transform_0, window_bounds = array<i64: 8, 32>}, {pipeline_mode = #tpu.pipeline_mode<synchronous>, transform_indices = @transform_1, window_bounds = array<i64: 32, 128>}, {pipeline_mode = #tpu.pipeline_mode<synchronous>, transform_indices = @transform_2, window_bounds = array<i64: 1, 128>}, {pipeline_mode = #tpu.pipeline_mode<synchronous>, transform_indices = @transform_3, window_bounds = array<i64: 1, 128>}, {transform_indices = @transform_4, window_bounds = array<i64: 1, 8>}]} {
    %c0 = arith.constant 0 : index
    %c0_0 = arith.constant 0 : index
    %0 = vector.load %arg1[%c0, %c0_0] : memref<8x32xf32, #tpu.memory_space<vmem>>, vector<8x32xf32>
    %c0_1 = arith.constant 0 : index
    %c0_2 = arith.constant 0 : index
    %1 = vector.load %arg2[%c0_1, %c0_2] : memref<32x128xf32, #tpu.memory_space<vmem>>, vector<32x128xf32>
    %cst = arith.constant dense<0.000000e+00> : vector<8x128xf32>
    %2 = tpu.matmul %0, %1, %cst {dimension_numbers = #tpu.dot_dimension_numbers<[1], [0], [0], [1], [0, 0, 1, 1], [], []>} : vector<8x32xf32>, vector<32x128xf32>, vector<8x128xf32> -> vector<8x128xf32>
    %c0_3 = arith.constant 0 : index
    %c0_4 = arith.constant 0 : index
    %3 = vector.load %arg3[%c0_3, %c0_4] : memref<1x128xf32, #tpu.memory_space<vmem>>, vector<1x128xf32>
    %4 = vector.broadcast %3 : vector<1x128xf32> to vector<8x128xf32>
    %5 = arith.addf %2, %4 : vector<8x128xf32>
    %cst_5 = arith.constant 0.000000e+00 : f32
    %6 = vector.broadcast %cst_5 : f32 to vector<8x128xf32>
    %7 = arith.maximumf %5, %6 : vector<8x128xf32>
    %c0_6 = arith.constant 0 : index
    %c0_7 = arith.constant 0 : index
    %8 = vector.load %arg4[%c0_6, %c0_7] : memref<1x128xf32, #tpu.memory_space<vmem>>, vector<1x128xf32>
    %cst_8 = arith.constant dense<0.000000e+00> : vector<1x8xf32>
    %9 = tpu.matmul %8, %7, %cst_8 {dimension_numbers = #tpu.dot_dimension_numbers<[1], [1], [0], [0], [0, 0, 1, 0], [], []>} : vector<1x128xf32>, vector<8x128xf32>, vector<1x8xf32> -> vector<1x8xf32>
    %10 = math.tanh %9 : vector<1x8xf32>
    %c0_9 = arith.constant 0 : index
    %c0_10 = arith.constant 0 : index
    %11 = vector.load %arg5[%c0_9, %c0_10] : memref<1x8xf32, #tpu.memory_space<vmem>>, vector<1x8xf32>
    tpu.vector_store %arg5[%c0_9, %c0_10], %10 {strides = array<i32>} : memref<1x8xf32, #tpu.memory_space<vmem>>, vector<1x8xf32>,
    return
  }
  func.func @transform_0(%arg0: i32) -> (i32, i32) {
    %c0_i32 = arith.constant 0 : i32
    %c0_i32_0 = arith.constant 0 : i32
    return %arg0, %c0_i32 : i32, i32
  }
  func.func @transform_1(%arg0: i32) -> (i32, i32) {
    %c0_i32 = arith.constant 0 : i32
    %c0_i32_0 = arith.constant 0 : i32
    %c0_i32_1 = arith.constant 0 : i32
    return %c0_i32, %c0_i32_0 : i32, i32
  }
  func.func @transform_2(%arg0: i32) -> (i32, i32) {
    %c0_i32 = arith.constant 0 : i32
    %c0_i32_0 = arith.constant 0 : i32
    %c0_i32_1 = arith.constant 0 : i32
    return %c0_i32, %c0_i32_0 : i32, i32
  }
  func.func @transform_3(%arg0: i32) -> (i32, i32) {
    %c0_i32 = arith.constant 0 : i32
    %c0_i32_0 = arith.constant 0 : i32
    %c0_i32_1 = arith.constant 0 : i32
    return %c0_i32, %c0_i32_0 : i32, i32
  }
  func.func @transform_4(%arg0: i32) -> (i32, i32) {
    %c0_i32 = arith.constant 0 : i32
    %c0_i32_0 = arith.constant 0 : i32
    return %c0_i32, %arg0 : i32, i32
  }
}

</mosaic_0001>

<bundles_post_ra>
// kernel: mine_forward.1
= control target key start
LH: loop header
LB: loop body
LE: loop exit
PB: predicated region body
PF: predicated region fallthrough
CT: control target
= control target key end

     0   :  { %9 = vsyncpa [#allocation3], 0  ;;  %s256_s0 = inlined_call_operand.hbm [shape: f32[8,32], index: 0, kind: input, shape index: {}]   ;;  %s257_s1 = inlined_call_operand.hbm [shape: f32[32,128], index: 1, kind: input, shape index: {}]   ;;  %s258_s2 = inlined_call_operand.vmem [shape: f32[1,128], index: 2, kind: input, shape index: {}]   ;;  %s259_s3 = inlined_call_operand.vmem [shape: f32[1,128], index: 3, kind: input, shape index: {}]   ;;  %s260_s4 = inlined_call_operand.hbm [shape: f32[1,8], index: 4, kind: output, shape index: {}]  }
   0x1   :  { %10 = vsyncpa [#allocation6], 0 }
   0x2   :  { %11 = vsyncpa [#allocation4], 0  ;;  %s17_s17 = sshll.u32 %s256_s0, 4  ;;  %s211_s18 = smov [#allocation2]   ;;  %s18_s17 = int_to_ptr.hbm [resolvable:$true] %s17_s17 }
   0x3   :  { %s19_s19 = sshll.u32 %s211_s18, 4  ;;  %s27_s22 = sshll.u32 %s257_s1, 4  ;;  %s20_s19 = int_to_ptr.vmem [resolvable:$true] %s19_s19  ;;  %s28_s22 = int_to_ptr.hbm [resolvable:$true] %s27_s22 }
   0x4   :  { %22 = dma.hbm_to_vmem [thread:$0]  %s18_s17, 128, %s20_s19, [#allocation3]  }
   0x5   :  { %s212_s23 = smov [#allocation5]   ;;  %s213_s25 = smov 128  }
   0x6   :  { %s29_s24 = sshll.u32 %s212_s23, 4  ;;  %s214_s26 = smov 8   ;;  %s30_s24 = int_to_ptr.vmem [resolvable:$true] %s29_s24 }
   0x7   :  { %35 = dma.hbm_to_vmem [thread:$0]  %s28_s22, 512, %s30_s24, [#allocation6], %s213_s25, %s213_s25, %s214_s26  }
   0x8   :  { %205 = dma.done.wait [#allocation3], 128  }
   0x9   :  { %206 = vsyncadd [#allocation3], 4294967168 }
   0xa   :  { %207 = dma.done.wait [#allocation6], 512  }
   0xb   :  { %208 = vsyncadd [#allocation6], 4294966784  ;;  %v52_v0 = vld [vmem:[#allocation5 + $0x18] sm:$0xff]  ;;  %v51_v1 = vld [vmem:[#allocation5 + $0x10] sm:$0xff]  ;;  %vm57_vm0 = vcmask 261120   ;;  %s215_s29 = smov [#allocation7]  }
   0xc   :  { %73 = vmatpush.msra.mxu0 %v52_v0  ;;  %v50_v2 = vld [vmem:[#allocation5 + $0x8] sm:$0xff]  ;;  %v49_v3 = vld [vmem:[#allocation5] sm:$0xff]  ;;  %v48_v4 = vld [vmem:[#allocation2] sm:$0xff]  ;;  %s111_s30 = sshll.u32 %s215_s29, 4  ;;  %s113_s7 = sshll.u32 %s260_s4, 4  ;;  %vm104_vm1 = vcmask 57344   ;;  %s112_s30 = int_to_ptr.vmem [resolvable:$true] %s111_s30  ;;  %s114_s7 = int_to_ptr.hbm [resolvable:$true] %s113_s7 }
   0xd   :  { %v130_v5 = vld [vmem:[%s258_s2] ss:$0 sm:$0xff] }
   0xe   :  { %74 = vmatpush.msra.mxu0 %v51_v1  ;;  %v82_v9 = vld [vmem:[%s259_s3] sm:$0x1] }
  0x10   :  { %75 = vmatpush.msra.mxu0 %v50_v2 }
  0x12   :  { %76 = vmatpush.msra.mxu0 %v49_v3 }
  0x13   :  { %124 = vmatmul.msk.f32.vlgmr.msra.gmra.mxu0 %vm57_vm0, %v48_v4 }
  0x90   :  { %v78_v6 = vpop.f32.mrf.mxu0 }
  0x91   :  { %v79_v7 = vadd.f32 %v130_v5, %v78_v6 }
  0x93   :  { %v81_v8 = vmax.f32 %v79_v7, 0.0 }
  0x95   :  { %98 = vmatpush.xpose.msra.mxu1 %v81_v8 }
  0x98   :  { %99 = vmatmul.f32.vlgmr.msra.gmra.mxu1 %v82_v9 }
 0x115   :  { %v100_v10 = vpop.f32.mrf.mxu1 }
 0x116   :  { %131 = vtanh.f32 %v100_v10 }
 0x11c   :  { %v132_v11 = vpop.eup %131 }
 0x11d   :  { %105 = vst.msk [vmem:[#allocation7] sm:$0x1] %vm104_vm1, %v132_v11 }
 0x11e   :  { %116 = dma.vmem_to_hbm [thread:$0]  %s112_s30, 16, %s114_s7, [#allocation4]  }
 0x11f   :  { %209 = dma.done.wait [#allocation4], 16  }
 0x120   :  { %210 = vsyncadd [#allocation4], 4294967280 }
 0x121   :  { %121 = vsyncpa [#allocation3], 1 }
 0x122   :  { %122 = vsyncpa [#allocation6], 1 }
 0x123   :  { %123 = vsyncpa [#allocation4], 1 }

</bundles_post_ra>
